<compile_context>
chip_gen: v5e
topology: v5e:2x2
jax: 0.10.0
libtpu: 0.0.40
codegen_flags: <defaults>
</compile_context>

<pallas_src>
import jax
import jax.numpy as jnp
from jax.experimental import pallas as pl
from jax.experimental.pallas import tpu as pltpu


def _round_up(x, m):
    return (x + m - 1) // m * m


def _pad2(x, rows, cols):
    """Zero-pad a 2-D array only if needed (no-op for tile-aligned shapes)."""
    r, c = x.shape
    if r == rows and c == cols:
        return x
    return jnp.zeros((rows, cols), x.dtype).at[:r, :c].set(x)


def graphsage_kernel(self_ref, adj_ref, feat_ref, w_self_ref, w_neigh_ref,
                     w_cls_ref, out_ref, acc_ref):
    j = pl.program_id(1)

    @pl.when(j == 0)
    def _init():
        acc_ref[...] = jnp.zeros_like(acc_ref)

    # Partial mean aggregation over the V (graph) axis:
    #   (tm, tv)f32 @ (tv, F)f32 -> f32 accumulate in VMEM scratch.
    acc_ref[...] += jnp.dot(adj_ref[...], feat_ref[...],
                            preferred_element_type=jnp.float32)

    @pl.when(j == pl.num_programs(1) - 1)
    def _finalize():
        # Encoder linear as two K=F contractions against resident split weights
        # (replaces the concat-into-scratch: no masked lane-offset stores).
        h = (jnp.dot(self_ref[...], w_self_ref[...],
                     preferred_element_type=jnp.float32)
             + jnp.dot(acc_ref[...], w_neigh_ref[...],
                       preferred_element_type=jnp.float32))
        embeds_t = jnp.maximum(h, 0.0)                    # == enc(nodes).T tile, (tm, E)
        # Classification head: (tm, E) @ (E, C_pad) -> lane-dense (tm, 128).
        out_ref[...] = jnp.dot(embeds_t, w_cls_ref[...],
                               preferred_element_type=jnp.float32)


def supervised_graphsage_forward(self_feats, adj_norm, features, w_enc, w_cls,
                                 *, tm=None, tv=None):
    """scores.t() of SupervisedGraphSage, computed as one gridded Pallas kernel."""
    N, F = self_feats.shape
    V = features.shape[0]
    E = w_enc.shape[0]
    assert w_enc.shape[1] == 2 * F
    C = w_cls.shape[0]
    C_PAD = 128                                     # lane-dense output width

    # ---- tile selection -----------------------------------------------------
    if tv is None:
        tv = min(2048, _round_up(V, 128))           # big V tiles: mem-bound kernel
    if tm is None:
        n16 = _round_up(N, 16)
        tm = min(512, n16)
        # Give the "parallel" row axis >= 2 tiles when the batch is large enough
        # (keeps both TensorCores busy on v7x; single tile otherwise).
        if tm == n16 and n16 >= 256:
            tm = _round_up(n16 // 2, 16)

    def _vmem_estimate(tm_, tv_):
        f = 4  # f32 bytes
        stream = 2 * (tm_ * tv_ + tv_ * F + tm_ * F) * f      # double-buffered inputs
        resident = (2 * F * E + E * C_PAD) * f                  # weights
        out_bufs = 2 * tm_ * C_PAD * f
        scratch = tm_ * F * f
        return stream + resident + out_bufs + scratch

    # Keep the working set comfortably under v7x's 64 MiB physical VMEM.
    VMEM_BUDGET = 40 << 20
    while _vmem_estimate(tm, tv) > VMEM_BUDGET and tv > 512:
        tv = max(512, _round_up(tv // 2, 128))
    while _vmem_estimate(tm, tv) > VMEM_BUDGET and tm > 128:
        tm = max(128, _round_up(tm // 2, 16))

    n_pad = _round_up(N, tm)
    v_pad = _round_up(V, tv)
    grid = (n_pad // tm, v_pad // tv)

    # ---- operands (no bf16 re-materialization; pad only when needed) --------
    sf = _pad2(self_feats.astype(jnp.float32), n_pad, F)
    adj = _pad2(adj_norm.astype(jnp.float32), n_pad, v_pad)
    ft = _pad2(features.astype(jnp.float32), v_pad, F)

    # Split + pre-transposed resident weights (wrapper-side layout plumbing only).
    w_self_t = w_enc[:, :F].T.astype(jnp.float32)                    # (F, E)
    w_neigh_t = w_enc[:, F:].T.astype(jnp.float32)                   # (F, E)
    w_cls_t = jnp.zeros((E, C_PAD), jnp.float32).at[:, :C].set(
        w_cls.T.astype(jnp.float32))                                 # (E, 128), padded cols 0

    # ---- cost model ----------------------------------------------------------
    flops = (2 * n_pad * v_pad * F            # aggregation matmul
             + 2 * n_pad * (2 * F) * E        # encoder (two K=F matmuls)
             + 2 * n_pad * E * C_PAD)         # classification head
    bytes_accessed = (adj.size * 4
                      + sf.size * 4
                      + ft.size * 4 * (n_pad // tm)   # features re-streamed per row tile
                      + (w_self_t.size + w_neigh_t.size + w_cls_t.size) * 4
                      + n_pad * C_PAD * 4)

    vmem_limit = min(48 << 20, max(32 << 20, 2 * _vmem_estimate(tm, tv)))

    out = pl.pallas_call(
        graphsage_kernel,
        out_shape=jax.ShapeDtypeStruct((n_pad, C_PAD), jnp.float32),
        grid_spec=pltpu.PrefetchScalarGridSpec(
            num_scalar_prefetch=0,
            grid=grid,
            in_specs=[
                pl.BlockSpec((tm, F), lambda i, j: (i, 0)),       # self feats (row tile)
                pl.BlockSpec((tm, tv), lambda i, j: (i, j)),      # row-normalized adj tile
                pl.BlockSpec((tv, F), lambda i, j: (j, 0)),       # feature tile (V-reduction)
                pl.BlockSpec((F, E), lambda i, j: (0, 0)),        # W_self^T   (VMEM-resident)
                pl.BlockSpec((F, E), lambda i, j: (0, 0)),        # W_neigh^T  (VMEM-resident)
                pl.BlockSpec((E, C_PAD), lambda i, j: (0, 0)),    # W_cls^T padded (resident)
            ],
            out_specs=pl.BlockSpec((tm, C_PAD), lambda i, j: (i, 0)),
            scratch_shapes=[
                pltpu.VMEM((tm, F), jnp.float32),                 # aggregation accumulator
            ],
        ),
        compiler_params=pltpu.CompilerParams(
            dimension_semantics=("parallel", "arbitrary"),
            vmem_limit_bytes=vmem_limit,
        ),
        cost_estimate=pl.CostEstimate(flops=flops, transcendentals=0,
                                      bytes_accessed=bytes_accessed),
    )(sf, adj, ft, w_self_t, w_neigh_t, w_cls_t)

    return out[:N, :C]


def _xavier_uniform(key, shape):
    fan_out, fan_in = shape
    bound = (6.0 / (fan_in + fan_out)) ** 0.5
    return jax.random.uniform(key, shape, jnp.float32, -bound, bound)


if __name__ == "__main__":
    key = jax.random.PRNGKey(0)
    k_feat, k_adj, k_enc, k_cls = jax.random.split(key, 4)

    # Small (but grid-exercising) synthetic GraphSAGE setup.
    V = 512           # total graph nodes
    F = 64            # raw feature dim
    E = 128           # enc.embed_dim
    C = 8             # num_classes
    N = 256           # batch of nodes  -> grid (2, 1) with tm=128, tv=512

    features = jax.random.normal(k_feat, (V, F), jnp.float32)

    # Row-normalized neighbor mask (MeanAggregator's mask.mm(embed_matrix)).
    adj = (jax.random.uniform(k_adj, (N, V)) < 0.25).astype(jnp.float32)
    rows = jnp.arange(N)
    adj = adj.at[rows, rows % V].set(1.0)            # guarantee >=1 neighbor per node
    adj_norm = adj / jnp.sum(adj, axis=1, keepdims=True)

    # Parameters (deterministic xavier-uniform, matching the module __init__ shapes).
    w_enc = _xavier_uniform(k_enc, (E, 2 * F))       # Encoder.weight  (embed_dim, 2*feat_dim)
    w_cls = _xavier_uniform(k_cls, (C, E))           # SupervisedGraphSage.weight (num_classes, embed_dim)

    nodes = jnp.arange(N)                            # batch node ids
    self_feats = features[nodes % V]                 # gather = glue, stays in JAX

    scores = supervised_graphsage_forward(self_feats, adj_norm, features, w_enc, w_cls)
    scores = jax.block_until_ready(scores)

    # Pure-JAX f32 reference of the exact PyTorch math.
    neigh_ref = adj_norm @ features
    combined = jnp.concatenate([self_feats, neigh_ref], axis=1)      # (N, 2F)
    embeds = jnp.maximum(w_enc @ combined.T, 0.0)                    # (E, N)
    scores_ref = (w_cls @ embeds).T                                  # (N, C)

    assert scores.shape == (N, C)
    err = float(jnp.max(jnp.abs(scores - scores_ref)))
    assert err < 5e-2, f"max abs err too large: {err}"
    print("KERNEL_OK")
</pallas_src>

<mosaic_0001>
module attributes {stable_mosaic.version = 11 : i64} {
  func.func @graphsage_kernel(%arg0: i32, %arg1: i32, %arg2: memref<128x64xf32, #tpu.memory_space<vmem>>, %arg3: memref<128x512xf32, #tpu.memory_space<vmem>>, %arg4: memref<512x64xf32, #tpu.memory_space<vmem>>, %arg5: memref<64x128xf32, #tpu.memory_space<vmem>>, %arg6: memref<64x128xf32, #tpu.memory_space<vmem>>, %arg7: memref<128x128xf32, #tpu.memory_space<vmem>>, %arg8: memref<128x128xf32, #tpu.memory_space<vmem>>, %arg9: memref<128x64xf32, #tpu.memory_space<vmem>>) attributes {dimension_semantics = [#tpu.dimension_semantics<parallel>, #tpu.dimension_semantics<arbitrary>], iteration_bounds = array<i64: 2, 1>, scalar_prefetch = 0 : i64, scratch_operands = 1 : i64, tpu.core_type = #tpu.core_type<tc>, window_params = [{transform_indices = @transform_0, window_bounds = array<i64: 128, 64>}, {transform_indices = @transform_1, window_bounds = array<i64: 128, 512>}, {transform_indices = @transform_2, window_bounds = array<i64: 512, 64>}, {pipeline_mode = #tpu.pipeline_mode<synchronous>, transform_indices = @transform_3, window_bounds = array<i64: 64, 128>}, {pipeline_mode = #tpu.pipeline_mode<synchronous>, transform_indices = @transform_4, window_bounds = array<i64: 64, 128>}, {pipeline_mode = #tpu.pipeline_mode<synchronous>, transform_indices = @transform_5, window_bounds = array<i64: 128, 128>}, {transform_indices = @transform_6, window_bounds = array<i64: 128, 128>}]} {
    %c0_i32 = arith.constant 0 : i32
    %0 = arith.cmpi eq, %arg1, %c0_i32 : i32
    %1 = arith.extui %0 : i1 to i32
    %c0_i32_0 = arith.constant 0 : i32
    %2 = arith.cmpi ne, %1, %c0_i32_0 : i32
    scf.if %2 {
      %cst_10 = arith.constant 0.000000e+00 : f32
      %12 = vector.broadcast %cst_10 : f32 to vector<128x64xf32>
      %c0_11 = arith.constant 0 : index
      %c0_12 = arith.constant 0 : index
      %13 = vector.load %arg9[%c0_11, %c0_12] : memref<128x64xf32, #tpu.memory_space<vmem>>, vector<128x64xf32>
      tpu.vector_store %arg9[%c0_11, %c0_12], %12 {strides = array<i32>} : memref<128x64xf32, #tpu.memory_space<vmem>>, vector<128x64xf32>,
    } else {
    }
    %c0 = arith.constant 0 : index
    %c0_1 = arith.constant 0 : index
    %3 = vector.load %arg9[%c0, %c0_1] : memref<128x64xf32, #tpu.memory_space<vmem>>, vector<128x64xf32>
    %c0_2 = arith.constant 0 : index
    %c0_3 = arith.constant 0 : index
    %4 = vector.load %arg3[%c0_2, %c0_3] : memref<128x512xf32, #tpu.memory_space<vmem>>, vector<128x512xf32>
    %c0_4 = arith.constant 0 : index
    %c0_5 = arith.constant 0 : index
    %5 = vector.load %arg4[%c0_4, %c0_5] : memref<512x64xf32, #tpu.memory_space<vmem>>, vector<512x64xf32>
    %cst = arith.constant dense<0.000000e+00> : vector<128x64xf32>
    %6 = tpu.matmul %4, %5, %cst {dimension_numbers = #tpu.dot_dimension_numbers<[1], [0], [0], [1], [0, 0, 1, 1], [], []>} : vector<128x512xf32>, vector<512x64xf32>, vector<128x64xf32> -> vector<128x64xf32>
    %7 = arith.addf %3, %6 : vector<128x64xf32>
    %c0_6 = arith.constant 0 : index
    %c0_7 = arith.constant 0 : index
    %8 = vector.load %arg9[%c0_6, %c0_7] : memref<128x64xf32, #tpu.memory_space<vmem>>, vector<128x64xf32>
    tpu.vector_store %arg9[%c0_6, %c0_7], %7 {strides = array<i32>} : memref<128x64xf32, #tpu.memory_space<vmem>>, vector<128x64xf32>,
    %c0_i32_8 = arith.constant 0 : i32
    %9 = arith.cmpi eq, %arg1, %c0_i32_8 : i32
    %10 = arith.extui %9 : i1 to i32
    %c0_i32_9 = arith.constant 0 : i32
    %11 = arith.cmpi ne, %10, %c0_i32_9 : i32
    scf.if %11 {
      %c0_10 = arith.constant 0 : index
      %c0_11 = arith.constant 0 : index
      %12 = vector.load %arg2[%c0_10, %c0_11] : memref<128x64xf32, #tpu.memory_space<vmem>>, vector<128x64xf32>
      %c0_12 = arith.constant 0 : index
      %c0_13 = arith.constant 0 : index
      %13 = vector.load %arg5[%c0_12, %c0_13] : memref<64x128xf32, #tpu.memory_space<vmem>>, vector<64x128xf32>
      %cst_14 = arith.constant dense<0.000000e+00> : vector<128x128xf32>
      %14 = tpu.matmul %12, %13, %cst_14 {dimension_numbers = #tpu.dot_dimension_numbers<[1], [0], [0], [1], [0, 0, 1, 1], [], []>} : vector<128x64xf32>, vector<64x128xf32>, vector<128x128xf32> -> vector<128x128xf32>
      %c0_15 = arith.constant 0 : index
      %c0_16 = arith.constant 0 : index
      %15 = vector.load %arg9[%c0_15, %c0_16] : memref<128x64xf32, #tpu.memory_space<vmem>>, vector<128x64xf32>
      %c0_17 = arith.constant 0 : index
      %c0_18 = arith.constant 0 : index
      %16 = vector.load %arg6[%c0_17, %c0_18] : memref<64x128xf32, #tpu.memory_space<vmem>>, vector<64x128xf32>
      %cst_19 = arith.constant dense<0.000000e+00> : vector<128x128xf32>
      %17 = tpu.matmul %15, %16, %cst_19 {dimension_numbers = #tpu.dot_dimension_numbers<[1], [0], [0], [1], [0, 0, 1, 1], [], []>} : vector<128x64xf32>, vector<64x128xf32>, vector<128x128xf32> -> vector<128x128xf32>
      %18 = arith.addf %14, %17 : vector<128x128xf32>
      %cst_20 = arith.constant 0.000000e+00 : f32
      %19 = vector.broadcast %cst_20 : f32 to vector<128x128xf32>
      %20 = arith.maximumf %18, %19 : vector<128x128xf32>
      %c0_21 = arith.constant 0 : index
      %c0_22 = arith.constant 0 : index
      %21 = vector.load %arg7[%c0_21, %c0_22] : memref<128x128xf32, #tpu.memory_space<vmem>>, vector<128x128xf32>
      %cst_23 = arith.constant dense<0.000000e+00> : vector<128x128xf32>
      %22 = tpu.matmul %20, %21, %cst_23 {dimension_numbers = #tpu.dot_dimension_numbers<[1], [0], [0], [1], [0, 0, 1, 1], [], []>} : vector<128x128xf32>, vector<128x128xf32>, vector<128x128xf32> -> vector<128x128xf32>
      %c0_24 = arith.constant 0 : index
      %c0_25 = arith.constant 0 : index
      %23 = vector.load %arg8[%c0_24, %c0_25] : memref<128x128xf32, #tpu.memory_space<vmem>>, vector<128x128xf32>
      tpu.vector_store %arg8[%c0_24, %c0_25], %22 {strides = array<i32>} : memref<128x128xf32, #tpu.memory_space<vmem>>, vector<128x128xf32>,
    } else {
    }
    return
  }
  func.func @transform_0(%arg0: i32, %arg1: i32) -> (i32, i32) {
    %c0_i32 = arith.constant 0 : i32
    %c0_i32_0 = arith.constant 0 : i32
    return %arg0, %c0_i32 : i32, i32
  }
  func.func @transform_1(%arg0: i32, %arg1: i32) -> (i32, i32) {
    %c0_i32 = arith.constant 0 : i32
    return %arg0, %arg1 : i32, i32
  }
  func.func @transform_2(%arg0: i32, %arg1: i32) -> (i32, i32) {
    %c0_i32 = arith.constant 0 : i32
    %c0_i32_0 = arith.constant 0 : i32
    return %arg1, %c0_i32 : i32, i32
  }
  func.func @transform_3(%arg0: i32, %arg1: i32) -> (i32, i32) {
    %c0_i32 = arith.constant 0 : i32
    %c0_i32_0 = arith.constant 0 : i32
    %c0_i32_1 = arith.constant 0 : i32
    return %c0_i32, %c0_i32_0 : i32, i32
  }
  func.func @transform_4(%arg0: i32, %arg1: i32) -> (i32, i32) {
    %c0_i32 = arith.constant 0 : i32
    %c0_i32_0 = arith.constant 0 : i32
    %c0_i32_1 = arith.constant 0 : i32
    return %c0_i32, %c0_i32_0 : i32, i32
  }
  func.func @transform_5(%arg0: i32, %arg1: i32) -> (i32, i32) {
    %c0_i32 = arith.constant 0 : i32
    %c0_i32_0 = arith.constant 0 : i32
    %c0_i32_1 = arith.constant 0 : i32
    return %c0_i32, %c0_i32_0 : i32, i32
  }
  func.func @transform_6(%arg0: i32, %arg1: i32) -> (i32, i32) {
    %c0_i32 = arith.constant 0 : i32
    %c0_i32_0 = arith.constant 0 : i32
    return %arg0, %c0_i32 : i32, i32
  }
}

</mosaic_0001>

<bundles_post_ra>
// kernel: tpu_custom_call.1
= control target key start
LH: loop header
LB: loop body
LE: loop exit
PB: predicated region body
PF: predicated region fallthrough
CT: control target
= control target key end

     0   :  { %11 = vsyncpa [#allocation4], 0  ;;  %s2315_s0 = inlined_call_operand.vmem [shape: f32[256,64], index: 0, kind: input, shape index: {}]   ;;  %s2316_s1 = inlined_call_operand.vmem [shape: f32[256,512], index: 1, kind: input, shape index: {}]   ;;  %s2317_s2 = inlined_call_operand.vmem [shape: f32[512,64], index: 2, kind: input, shape index: {}]   ;;  %s2318_s3 = inlined_call_operand.hbm [shape: f32[64,128], index: 3, kind: input, shape index: {}]   ;;  %s2319_s4 = inlined_call_operand.hbm [shape: f32[64,128], index: 4, kind: input, shape index: {}]   ;;  %s2320_s5 = inlined_call_operand.vmem [shape: f32[128,128], index: 5, kind: input, shape index: {}]   ;;  %s2321_s6 = inlined_call_operand.hbm [shape: f32[256,128], index: 6, kind: output, shape index: {}]  }
   0x1   :  { %12 = vsyncpa [#allocation7], 0 }
   0x2   :  { %13 = vsyncpa [#allocation5], 0 }
   0x3   :  { %15 = vsyncpa [#allocation5 + $0x1], 0  ;;  %s1725_s21 = smov 0   ;;  %s1727_s22 = smov 0  }
   0x4   :  { %s1729_s23 = smov 0   ;;  %s1731_s24 = smov 0  }
   0x5   :  { %s1733_s25 = smov 0   ;;  %s1735_s26 = smov 0  }
   0x6 LB: > { %s1351_s27 = sadd.s32 4294967295, %s1681_s26   ;;  %s1352_s28 = sadd.s32 4294967294, %s1681_s26   ;;  %s1681_s26 = sphi %s1735_s26, %s21_s26   ;;  %s1677_s25 = sphi %s1733_s25, %s2330_s25   ;;  %s1673_s24 = sphi %s1731_s24, %s2329_s24   ;;  %s1669_s23 = sphi %s1729_s23, %s2328_s23   ;;  %s1665_s22 = sphi %s1727_s22, %s2327_s22   ;;  %s1661_s21 = sphi %s1725_s21, %s2326_s21  }
   0x7   : > { %s33_s29 = sadd.s32 1, %s1677_s25  ;;  %s183_s30 = sadd.s32 1, %s1669_s23 }
   0x8   : > { %p35_p0 = scmp.ge.s32.totalorder %s33_s29, 2  ;;  %p193_p1 = scmp.ne.s32.totalorder %s1669_s23, %s1665_s22 }
   0x9   : > { %p194_p2 = scmp.eq.s32.totalorder %s1351_s27, 1  ;;  %p199_p3 = scmp.ne.s32.totalorder %s1665_s22, %s1661_s21 }
   0xa   : > { %s2332_s29 = smov (%p35_p0, %s33_s29), 0  ;;  %p200_p5 = scmp.eq.s32.totalorder %s1352_s28, 1 }
   0xb   : > { %p1765_p4 = por %p194_p2, %p193_p1  ;;  %s180_s8 = ssub.s32 %s1677_s25, %s2332_s29 }
   0xc   : > { %p1353_p6 = scmp.ge.s32.totalorder %s1681_s26, 1  ;;  %p181_p7 = scmp.eq.s32.totalorder %s180_s8, 0 }
   0xd   : > { %p1772_p8 = por %p200_p5, %p199_p3  ;;  %p207_p9 = scmp.lt.s32.totalorder %s1681_s26, 3 }
   0xe   : > { %s1778_s10 = scalar_select %p181_p7, %s1669_s23, %s183_s30  }
   0xf   : > { %p1780_p10 = pnand %p1353_p6, %p207_p9  ;;  %p1784_p11 = scmp.eq.s32.totalorder %s1351_s27, 0 }
  0x10   : > { %s227_s15 = sshll.u32 %s2318_s3, 4  ;;  %s1683_s16 = smov [#allocation3]   ;;  %s228_s15 = int_to_ptr.hbm [resolvable:$true] %s227_s15 }
  0x11   : > { %p1464_p12 = pneg %p1780_p10  ;;  %s229_s17 = sshll.u32 %s1683_s16, 4  ;;  %s230_s17 = int_to_ptr.vmem [resolvable:$true] %s229_s17 }
  0x12   : > { %s241_s20 = sshll.u32 %s2319_s4, 4  ;;  %s1684_s27 = smov 128   ;;  %s242_s20 = int_to_ptr.hbm [resolvable:$true] %s241_s20 }
  0x13   : > { %p1465_p13 = pnand %p1784_p11, %p1464_p12  ;;  %s1685_s28 = smov 8  }
  0x14   : > { %s1686_s30 = smov [#allocation6]   ;;  %286 = sbr.rel (%p1780_p10) target bundleno = 686 (0x2ae), region = 44 }
  0x15   : > { %1467 = dma.hbm_to_vmem [thread:$0]  (!%p1465_p13), %s228_s15, 1024, %s230_s17, [#allocation4], %s1684_s27, %s1684_s27, %s1685_s28  }
  0x16   : > { %s243_s8 = sshll.u32 %s1686_s30, 4  ;;  %s244_s8 = int_to_ptr.vmem [resolvable:$true] %s243_s8 }
  0x17   : > { %1470 = dma.hbm_to_vmem [thread:$0]  (!%p1465_p13), %s242_s20, 1024, %s244_s8, [#allocation7], %s1684_s27, %s1684_s27, %s1685_s28  }
  0x19   : > { %1648 = dma.done.wait (%p1784_p11), [#allocation4], 1024  }
  0x1a   : > { %1650 = vsyncadd (%p1784_p11), [#allocation4], 4294966272 }
  0x1b   : > { %1652 = dma.done.wait (%p1784_p11), [#allocation7], 1024  }
  0x1c   : > { %1654 = vsyncadd (%p1784_p11), [#allocation7], 4294966272  ;;  %v478_v0 = vld [vmem:[%s2317_s2 + $0x78] sm:$0xff]  ;;  %v477_v1 = vld [vmem:[%s2317_s2 + $0x70] sm:$0xff]  ;;  %s1362_s27 = sshll.u32 %s1673_s24, 4  ;;  %vm366_vm0 = vcmask 523264  }
  0x1d   : > { %1406 = vmatpush.msra.mxu3 %v478_v0  ;;  %527 = vmatpush.msra.mxu0 %v478_v0  ;;  %v476_v2 = vld [vmem:[%s2317_s2 + $0x68] sm:$0xff]  ;;  %v475_v3 = vld [vmem:[%s2317_s2 + $0x60] sm:$0xff]  ;;  %v1823_v4 = vld [vmem:[%s2317_s2 + $0xf8] sm:$0xff]  ;;  %p338_p0 = scmp.lt.s32.totalorder %s1362_s27, 31  ;;  %s1405_s18 = sshll.u32 %s1673_s24, 7 }
  0x1e   : > { %v474_v5 = vld [vmem:[%s2317_s2 + $0x58] sm:$0xff]  ;;  %592 = vmatpush.msra.mxu1 %v1823_v4  ;;  %v1832_v6 = vld [vmem:[%s2317_s2 + $0xf0] sm:$0xff]  ;;  %v1841_v8 = vld [vmem:[%s2317_s2 + $0xe8] sm:$0xff]  ;;  %s1222_s20 = scalar_lea.hbm %s2321_s6, %s1405_s18  ;;  %s1615_s14 = scalar_lea.hbm %s2321_s6, 256 }
  0x1f   : > { %1407 = vmatpush.msra.mxu3 %v477_v1  ;;  %528 = vmatpush.msra.mxu0 %v477_v1  ;;  %v473_v7 = vld [vmem:[%s2317_s2 + $0x50] sm:$0xff]  ;;  %v472_v9 = vld [vmem:[%s2317_s2 + $0x48] sm:$0xff]  ;;  %v1850_v10 = vld [vmem:[%s2317_s2 + $0xe0] sm:$0xff]  ;;  %s2334_s27 = smov (!%p338_p0, %s1362_s27), 31 }
  0x20   : > { %593 = vmatpush.msra.mxu1 %v1832_v6  ;;  %v471_v11 = vld [vmem:[%s2317_s2 + $0x40] sm:$0xff]  ;;  %v1860_v12 = vld [vmem:[%s2317_s2 + $0xd8] sm:$0xff]  ;;  %v1869_v14 = vld [vmem:[%s2317_s2 + $0xd0] sm:$0xff]  ;;  %s1404_s11 = sshll.u32 %s2334_s27, 5  ;;  %s1363_s12 = sshll.u32 %s2334_s27, 3 }
  0x21   : > { %1408 = vmatpush.msra.mxu3 %v476_v2  ;;  %529 = vmatpush.msra.mxu0 %v476_v2  ;;  %v470_v13 = vld [vmem:[%s2317_s2 + $0x38] sm:$0xff]  ;;  %v469_v15 = vld [vmem:[%s2317_s2 + $0x30] sm:$0xff]  ;;  %v1878_v16 = vld [vmem:[%s2317_s2 + $0xc8] sm:$0xff]  ;;  %s1920_s15 = scalar_lea.vmem %s2316_s1, %s1404_s11  ;;  %s2131_s28 = scalar_lea.vmem %s2315_s0, %s1363_s12 }
  0x22   : > { %594 = vmatpush.msra.mxu1 %v1841_v8  ;;  %v468_v17 = vld [vmem:[%s2317_s2 + $0x28] sm:$0xff]  ;;  %v1889_v18 = vld [vmem:[%s2317_s2 + $0xc0] sm:$0xff]  ;;  %v1898_v20 = vld [vmem:[%s2317_s2 + $0xb8] sm:$0xff]  ;;  %s1225_s27 = sshll.u32 %s1222_s20, 4  ;;  %s1226_s27 = int_to_ptr.hbm [resolvable:$true] %s1225_s27 }
  0x23   : > { %1409 = vmatpush.msra.mxu3 %v475_v3  ;;  %530 = vmatpush.msra.mxu0 %v475_v3  ;;  %v467_v19 = vld [vmem:[%s2317_s2 + $0x20] sm:$0xff]  ;;  %v466_v21 = vld [vmem:[%s2317_s2 + $0x18] sm:$0xff]  ;;  %v485_v22 = vld [vmem:[%s2317_s2 + $0xb0] sm:$0xff]  ;;  %s1609_s30 = sshra.s32 %s1226_s27, 4  ;;  %s1610_s30 = int_to_ptr.hbm [resolvable:$true] %s1609_s30 }
  0x24   : > { %595 = vmatpush.msra.mxu1 %v1850_v10  ;;  %v465_v23 = vld [vmem:[%s2317_s2 + $0x10] sm:$0xff]  ;;  %v484_v24 = vld [vmem:[%s2317_s2 + $0xa8] sm:$0xff]  ;;  %v483_v26 = vld [vmem:[%s2317_s2 + $0xa0] sm:$0xff]  ;;  %s1611_s8 = scalar_lea.hbm %s1610_s30, 128  ;;  %p1616_p5 = scmp.lt.s32.totalorder %s1610_s30, %s2321_s6 }
  0x25   : > { %1410 = vmatpush.msra.mxu3 %v474_v5  ;;  %531 = vmatpush.msra.mxu0 %v474_v5  ;;  %v464_v25 = vld [vmem:[%s2317_s2 + $0x8] sm:$0xff]  ;;  %v463_v27 = vld [vmem:[%s2317_s2] sm:$0xff]  ;;  %v482_v29 = vld [vmem:[%s2317_s2 + $0x98] sm:$0xff]  ;;  %p1612_p1 = scmp.ne.s32.totalorder %s1610_s30, %s1611_s8  ;;  %p1617_p6 = scmp.lt.s32.totalorder %s1615_s14, %s1611_s8 }
  0x26   : > { %596 = vmatpush.msra.mxu1 %v1860_v12  ;;  %v447_v28 = vld [vmem:[%s1920_s15 + $0x180] sm:$0xff]  ;;  %v481_v30 = vld [vmem:[%s2317_s2 + $0x90] sm:$0xff]  ;;  %v510_v31 = vld [vmem:[%s2317_s2 + $0x178] sm:$0xff] }
  0x27   : > { %1411 = vmatpush.msra.mxu3 %v473_v7  ;;  %532 = vmatpush.msra.mxu0 %v473_v7  ;;  %v480_v32 = vld [vmem:[%s2317_s2 + $0x88] sm:$0xff]  ;;  %v509_v33 = vld [vmem:[%s2317_s2 + $0x170] sm:$0xff]  ;;  %v479_v34 = vld [vmem:[%s2317_s2 + $0x80] sm:$0xff]  ;;  %p1613_p2 = pnand %p1612_p1, %p1765_p4  ;;  %p1618_p7 = por %p1617_p6, %p1616_p5 }
  0x28   : > { %597 = vmatpush.msra.mxu1 %v1869_v14  ;;  %657 = vmatpush.msra.mxu2 %v510_v31  ;;  %v508_v35 = vld [vmem:[%s2317_s2 + $0x168] sm:$0xff]  ;;  %v451_v36 = vld [vmem:[%s1920_s15 + $0x1a0] sm:$0xff]  ;;  %v506_v38 = vld [vmem:[%s2317_s2 + $0x158] sm:$0xff] }
  0x29   : > { %1412 = vmatpush.msra.mxu3 %v472_v9  ;;  %533 = vmatpush.msra.mxu0 %v472_v9  ;;  %v507_v37 = vld [vmem:[%s2317_s2 + $0x160] sm:$0xff]  ;;  %v505_v39 = vld [vmem:[%s2317_s2 + $0x150] sm:$0xff]  ;;  %v504_v40 = vld [vmem:[%s2317_s2 + $0x148] sm:$0xff]  ;;  %p1614_p3 = pneg %p1613_p2 }
  0x2a   : > { %598 = vmatpush.msra.mxu1 %v1878_v16  ;;  %658 = vmatpush.msra.mxu2 %v509_v33  ;;  %v455_v41 = vld [vmem:[%s1920_s15 + $0x1c0] sm:$0xff]  ;;  %v502_v43 = vld [vmem:[%s2317_s2 + $0x138] sm:$0xff]  ;;  %v501_v44 = vld [vmem:[%s2317_s2 + $0x130] sm:$0xff] }
  0x2b   : > { %1413 = vmatpush.msra.mxu3 %v471_v11  ;;  %534 = vmatpush.msra.mxu0 %v471_v11  ;;  %v503_v42 = vld [vmem:[%s2317_s2 + $0x140] sm:$0xff]  ;;  %v500_v45 = vld [vmem:[%s2317_s2 + $0x128] sm:$0xff]  ;;  %v498_v48 = vld [vmem:[%s2317_s2 + $0x118] sm:$0xff]  ;;  %p1619_p9 = pnand %p1618_p7, %p1614_p3 }
  0x2c   : > { %599 = vmatpush.msra.mxu1 %v1889_v18  ;;  %659 = vmatpush.msra.mxu2 %v508_v35  ;;  %v459_v46 = vld [vmem:[%s1920_s15 + $0x1e0] sm:$0xff]  ;;  %v497_v49 = vld [vmem:[%s2317_s2 + $0x110] sm:$0xff]  ;;  %v496_v50 = vld [vmem:[%s2317_s2 + $0x108] sm:$0xff] }
  0x2d   : > { %1414 = vmatpush.msra.mxu3 %v470_v13  ;;  %535 = vmatpush.msra.mxu0 %v470_v13  ;;  %v499_v47 = vld [vmem:[%s2317_s2 + $0x120] sm:$0xff]  ;;  %v448_v51 = vld [vmem:[%s1920_s15 + $0x188] sm:$0xff]  ;;  %v449_v56 = vld [vmem:[%s1920_s15 + $0x190] sm:$0xff] }
  0x2e   : > { %600 = vmatpush.msra.mxu1 %v1898_v20  ;;  %660 = vmatpush.msra.mxu2 %v507_v37  ;;  %v495_v52 = vld [vmem:[%s2317_s2 + $0x100] sm:$0xff]  ;;  %v452_v53 = vld [vmem:[%s1920_s15 + $0x1a8] sm:$0xff]  ;;  %v401_v57 = vld [vmem:[%s1920_s15 + $0x10] sm:$0xff] }
  0x2f   : > { %1415 = vmatpush.msra.mxu3 %v469_v15  ;;  %536 = vmatpush.msra.mxu0 %v469_v15  ;;  %v456_v54 = vld [vmem:[%s1920_s15 + $0x1c8] sm:$0xff]  ;;  %v526_v58 = vld [vmem:[%s2317_s2 + $0x1f8] sm:$0xff]  ;;  %v525_v59 = vld [vmem:[%s2317_s2 + $0x1f0] sm:$0xff] }
  0x30   : > { %601 = vmatpush.msra.mxu1 %v485_v22  ;;  %661 = vmatpush.msra.mxu2 %v506_v38  ;;  %v460_v55 = vld [vmem:[%s1920_s15 + $0x1e8] sm:$0xff]  ;;  %v399_v60 = vld [vmem:[%s1920_s15] sm:$0xff]  ;;  %v405_v63 = vld [vmem:[%s1920_s15 + $0x30] sm:$0xff] }
  0x31   : > { %1416 = vmatpush.msra.mxu3 %v468_v17  ;;  %537 = vmatpush.msra.mxu0 %v468_v17  ;;  %v400_v61 = vld [vmem:[%s1920_s15 + $0x8] sm:$0xff]  ;;  %v523_v0 = vld [vmem:[%s2317_s2 + $0x1e0] sm:$0xff]  ;;  %v453_v1 = vld [vmem:[%s1920_s15 + $0x1b0] sm:$0xff] }
  0x32   : > { %602 = vmatpush.msra.mxu1 %v484_v24  ;;  %662 = vmatpush.msra.mxu2 %v505_v39  ;;  %v524_v62 = vld [vmem:[%s2317_s2 + $0x1e8] sm:$0xff]  ;;  %v522_v2 = vld [vmem:[%s2317_s2 + $0x1d8] sm:$0xff]  ;;  %v521_v3 = vld [vmem:[%s2317_s2 + $0x1d0] sm:$0xff] }
  0x33   : > { %1417 = vmatpush.msra.mxu3 %v467_v19  ;;  %538 = vmatpush.msra.mxu0 %v467_v19  ;;  %v404_v5 = vld [vmem:[%s1920_s15 + $0x28] sm:$0xff]  ;;  %v409_v7 = vld [vmem:[%s1920_s15 + $0x50] sm:$0xff] }
  0x34   : > { %603 = vmatpush.msra.mxu1 %v483_v26  ;;  %663 = vmatpush.msra.mxu2 %v504_v40  ;;  %v457_v9 = vld [vmem:[%s1920_s15 + $0x1d0] sm:$0xff]  ;;  %v408_v13 = vld [vmem:[%s1920_s15 + $0x48] sm:$0xff] }
  0x35   : > { %1418 = vmatpush.msra.mxu3 %v466_v21  ;;  %539 = vmatpush.msra.mxu0 %v466_v21  ;;  %v517_v11 = vld [vmem:[%s2317_s2 + $0x1b0] sm:$0xff]  ;;  %v412_v21 = vld [vmem:[%s1920_s15 + $0x68] sm:$0xff] }
  0x36   : > { %604 = vmatpush.msra.mxu1 %v482_v29  ;;  %664 = vmatpush.msra.mxu2 %v503_v42  ;;  %v413_v15 = vld [vmem:[%s1920_s15 + $0x70] sm:$0xff] }
  0x37   : > { %1419 = vmatpush.msra.mxu3 %v465_v23  ;;  %540 = vmatpush.msra.mxu0 %v465_v23  ;;  %v461_v17 = vld [vmem:[%s1920_s15 + $0x1f0] sm:$0xff] }
  0x38   : > { %605 = vmatpush.msra.mxu1 %v481_v30  ;;  %665 = vmatpush.msra.mxu2 %v502_v43  ;;  %v513_v19 = vld [vmem:[%s2317_s2 + $0x190] sm:$0xff] }
  0x39   : > { %1420 = vmatpush.msra.mxu3 %v464_v25  ;;  %541 = vmatpush.msra.mxu0 %v464_v25  ;;  %v417_v23 = vld [vmem:[%s1920_s15 + $0x90] sm:$0xff]  ;;  %v402_v25 = vld [vmem:[%s1920_s15 + $0x18] sm:$0xff] }
  0x3a   : > { %606 = vmatpush.msra.mxu1 %v480_v32  ;;  %666 = vmatpush.msra.mxu2 %v501_v44 }
  0x3b   : > { %1421 = vmatpush.msra.mxu3 %v463_v27  ;;  %542 = vmatpush.msra.mxu0 %v463_v27  ;;  %v416_v27 = vld [vmem:[%s1920_s15 + $0x88] sm:$0xff] }
  0x3c   : > { %579 = vmatmul.f32.vlgmr.msra.gmra.mxu3 %v447_v28  ;;  %607 = vmatpush.msra.mxu1 %v479_v34  ;;  %v421_v28 = vld [vmem:[%s1920_s15 + $0xb0] sm:$0xff] }
  0x3d   : > { %1422 = vmatpush.msrb.mxu3 %v1823_v4  ;;  %667 = vmatpush.msra.mxu2 %v500_v45  ;;  %v403_v4 = vld [vmem:[%s1920_s15 + $0x20] sm:$0xff] }
  0x3e   : > { %543 = vmatmul.f32.vlgmr.msra.gmra.mxu0 %v399_v60  ;;  %608 = vmatmul.f32.vlgmr.msra.gmra.mxu1 %v400_v61  ;;  %v867_v61 = vld [vmem:[#allocation6 + $0x20] sm:$0xff] }
  0x3f   : > { %1423 = vmatpush.msrb.mxu3 %v1832_v6  ;;  %668 = vmatpush.msra.mxu2 %v499_v47  ;;  %v520_v6 = vld [vmem:[%s2317_s2 + $0x1c8] sm:$0xff] }
  0x41   : > { %1424 = vmatpush.msrb.mxu3 %v1841_v8  ;;  %669 = vmatpush.msra.mxu2 %v498_v48  ;;  %v519_v8 = vld [vmem:[%s2317_s2 + $0x1c0] sm:$0xff] }
  0x43   : > { %1425 = vmatpush.msrb.mxu3 %v1850_v10  ;;  %670 = vmatpush.msra.mxu2 %v497_v49  ;;  %v518_v10 = vld [vmem:[%s2317_s2 + $0x1b8] sm:$0xff] }
  0x44   : > { %582 = vmatmul.f32.gmra.mxu3 %v451_v36  ;;  %v423_v36 = vld [vmem:[%s1920_s15 + $0xc0] sm:$0xff] }
  0x45   : > { %1426 = vmatpush.msrb.mxu3 %v1860_v12  ;;  %671 = vmatpush.msra.mxu2 %v496_v50  ;;  %v407_v12 = vld [vmem:[%s1920_s15 + $0x40] sm:$0xff] }
  0x46   : > { %546 = vmatmul.f32.gmra.mxu0 %v403_v4  ;;  %611 = vmatmul.f32.gmra.mxu1 %v404_v5  ;;  %v434_v4 = vld [vmem:[%s1920_s15 + $0x118] sm:$0xff] }
  0x47   : > { %1427 = vmatpush.msrb.mxu3 %v1869_v14  ;;  %672 = vmatpush.msra.mxu2 %v495_v52  ;;  %v516_v14 = vld [vmem:[%s2317_s2 + $0x1a8] sm:$0xff]  ;;  %v866_v5 = vld [vmem:[#allocation6 + $0x18] sm:$0xff] }
  0x48   : > { %673 = vmatmul.f32.vlgmr.msra.gmra.mxu2 %v401_v57  ;;  %v426_v57 = vld [vmem:[%s1920_s15 + $0xd8] sm:$0xff] }
  0x49   : > { %1428 = vmatpush.msrb.mxu3 %v1878_v16  ;;  %v515_v16 = vld [vmem:[%s2317_s2 + $0x1a0] sm:$0xff] }
  0x4b   : > { %1429 = vmatpush.msrb.mxu3 %v1889_v18  ;;  %v514_v18 = vld [vmem:[%s2317_s2 + $0x198] sm:$0xff] }
  0x4c   : > { %585 = vmatmul.f32.gmra.mxu3 %v455_v41  ;;  %v428_v41 = vld [vmem:[%s1920_s15 + $0xe8] sm:$0xff] }
  0x4d   : > { %1430 = vmatpush.msrb.mxu3 %v1898_v20  ;;  %v411_v20 = vld [vmem:[%s1920_s15 + $0x60] sm:$0xff] }
  0x4e   : > { %549 = vmatmul.f32.gmra.mxu0 %v407_v12  ;;  %614 = vmatmul.f32.gmra.mxu1 %v408_v13  ;;  %v865_v12 = vld [vmem:[#allocation6 + $0x10] sm:$0xff] }
  0x4f   : > { %1431 = vmatpush.msrb.mxu3 %v485_v22  ;;  %v512_v22 = vld [vmem:[%s2317_s2 + $0x188] sm:$0xff]  ;;  %v841_v13 = vld [vmem:[#allocation3 + $0x10] sm:$0xff] }
  0x50   : > { %676 = vmatmul.f32.gmra.mxu2 %v405_v63  ;;  %v445_v63 = vld [vmem:[%s1920_s15 + $0x170] sm:$0xff] }
  0x51   : > { %1432 = vmatpush.msrb.mxu3 %v484_v24  ;;  %v511_v24 = vld [vmem:[%s2317_s2 + $0x180] sm:$0xff] }
  0x53   : > { %1433 = vmatpush.msrb.mxu3 %v483_v26  ;;  %v415_v26 = vld [vmem:[%s1920_s15 + $0x80] sm:$0xff] }
  0x54   : > { %588 = vmatmul.f32.gmra.mxu3 %v459_v46  ;;  %v431_v46 = vld [vmem:[%s1920_s15 + $0x100] sm:$0xff] }
  0x55   : > { %1434 = vmatpush.msrb.mxu3 %v482_v29  ;;  %v406_v29 = vld [vmem:[%s1920_s15 + $0x38] sm:$0xff] }
  0x56   : > { %552 = vmatmul.f32.gmra.mxu0 %v411_v20  ;;  %617 = vmatmul.f32.gmra.mxu1 %v412_v21 }
  0x57   : > { %1435 = vmatpush.msrb.mxu3 %v481_v30  ;;  %v419_v30 = vld [vmem:[%s1920_s15 + $0xa0] sm:$0xff] }
  0x58   : > { %679 = vmatmul.f32.gmra.mxu2 %v409_v7 }
  0x59   : > { %1436 = vmatpush.msrb.mxu3 %v480_v32  ;;  %v425_v32 = vld [vmem:[%s1920_s15 + $0xd0] sm:$0xff] }
  0x5b   : > { %1437 = vmatpush.msrb.mxu3 %v479_v34  ;;  %v870_v34 = vld [vmem:[#allocation6 + $0x38] sm:$0xff] }
  0x5c   : > { %644 = vmatmul.f32.vlgmr.msrb.gmra.mxu3 %v448_v51  ;;  %927 = vmatpush.msrb.mxu0 %v870_v34  ;;  %v868_v51 = vld [vmem:[#allocation6 + $0x28] sm:$0xff] }
  0x5d   : > { %1438 = vmatpush.msra.mxu3 %v510_v31  ;;  %v420_v31 = vld [vmem:[%s1920_s15 + $0xa8] sm:$0xff] }
  0x5e   : > { %555 = vmatmul.f32.gmra.mxu0 %v415_v26  ;;  %620 = vmatmul.f32.gmra.mxu1 %v416_v27 }
  0x5f   : > { %1439 = vmatpush.msra.mxu3 %v509_v33  ;;  %v410_v33 = vld [vmem:[%s1920_s15 + $0x58] sm:$0xff] }
  0x60   : > { %682 = vmatmul.f32.gmra.mxu2 %v413_v15 }
  0x61   : > { %1440 = vmatpush.msra.mxu3 %v508_v35  ;;  %v846_v35 = vld [vmem:[#allocation3 + $0x38] sm:$0xff] }
  0x62   : > { %1040 = vmatpush.msrb.mxu1 %v846_v35  ;;  %v458_v35 = vld [vmem:[%s1920_s15 + $0x1d8] sm:$0xff] }
  0x63   : > { %1441 = vmatpush.msra.mxu3 %v507_v37  ;;  %v424_v37 = vld [vmem:[%s1920_s15 + $0xc8] sm:$0xff] }
  0x64   : > { %647 = vmatmul.f32.gmra.mxu3 %v452_v53  ;;  %v435_v53 = vld [vmem:[%s1920_s15 + $0x120] sm:$0xff] }
  0x65   : > { %1442 = vmatpush.msra.mxu3 %v506_v38  ;;  %v429_v38 = vld [vmem:[%s1920_s15 + $0xf0] sm:$0xff] }
  0x66   : > { %558 = vmatmul.f32.gmra.mxu0 %v419_v30  ;;  %623 = vmatmul.f32.gmra.mxu1 %v420_v31  ;;  %v863_v30 = vld [vmem:[#allocation6] sm:$0xff] }
  0x67   : > { %1443 = vmatpush.msra.mxu3 %v505_v39  ;;  %v414_v39 = vld [vmem:[%s1920_s15 + $0x78] sm:$0xff]  ;;  %v839_v31 = vld [vmem:[#allocation3] sm:$0xff] }
  0x68   : > { %685 = vmatmul.f32.gmra.mxu2 %v417_v23  ;;  %v1687_v23 = vmov 0.0  }
  0x69   : > { %1444 = vmatpush.msra.mxu3 %v504_v40  ;;  %v427_v40 = vld [vmem:[%s1920_s15 + $0xe0] sm:$0xff]  ;;  %367 = vst.msk [vmem:[#allocation2] sm:$0xff] %vm366_vm0, %v1687_v23 }
  0x6a   : > { %368 = vst.msk [vmem:[#allocation2 + $0x8] sm:$0xff] %vm366_vm0, %v1687_v23 }
  0x6b   : > { %1445 = vmatpush.msra.mxu3 %v503_v42  ;;  %v869_v42 = vld [vmem:[#allocation6 + $0x30] sm:$0xff]  ;;  %369 = vst.msk [vmem:[#allocation2 + $0x10] sm:$0xff] %vm366_vm0, %v1687_v23 }
  0x6c   : > { %650 = vmatmul.f32.gmra.mxu3 %v456_v54  ;;  %928 = vmatpush.msrb.mxu0 %v869_v42  ;;  %v436_v54 = vld [vmem:[%s1920_s15 + $0x128] sm:$0xff]  ;;  %370 = vst.msk [vmem:[#allocation2 + $0x18] sm:$0xff] %vm366_vm0, %v1687_v23 }
  0x6d   : > { %1446 = vmatpush.msra.mxu3 %v502_v43  ;;  %v845_v43 = vld [vmem:[#allocation3 + $0x30] sm:$0xff]  ;;  %371 = vst.msk [vmem:[#allocation2 + $0x20] sm:$0xff] %vm366_vm0, %v1687_v23 }
  0x6e   : > { %561 = vmatmul.f32.gmra.mxu0 %v423_v36  ;;  %626 = vmatmul.f32.gmra.mxu1 %v424_v37  ;;  %372 = vst.msk [vmem:[#allocation2 + $0x28] sm:$0xff] %vm366_vm0, %v1687_v23  ;;  %v823_v37 = vld [vmem:[%s2131_s28] sm:$0xff] }
  0x6f   : > { %1447 = vmatpush.msra.mxu3 %v501_v44  ;;  %v433_v44 = vld [vmem:[%s1920_s15 + $0x110] sm:$0xff]  ;;  %1041 = vmatpush.msrb.mxu1 %v845_v43  ;;  %373 = vst.msk [vmem:[#allocation2 + $0x30] sm:$0xff] %vm366_vm0, %v1687_v23 }
  0x70   : > { %688 = vmatmul.f32.gmra.mxu2 %v421_v28  ;;  %929 = vmatpush.msrb.mxu0 %v868_v51  ;;  %374 = vst.msk [vmem:[#allocation2 + $0x38] sm:$0xff] %vm366_vm0, %v1687_v23  ;;  %v454_v28 = vld [vmem:[%s1920_s15 + $0x1b8] sm:$0xff] }
  0x71   : > { %1448 = vmatpush.msra.mxu3 %v500_v45  ;;  %v418_v45 = vld [vmem:[%s1920_s15 + $0x98] sm:$0xff]  ;;  %375 = vst.msk [vmem:[#allocation2 + $0x40] sm:$0xff] %vm366_vm0, %v1687_v23 }
  0x72   : > { %930 = vmatpush.msrb.mxu0 %v867_v61  ;;  %376 = vst.msk [vmem:[#allocation2 + $0x48] sm:$0xff] %vm366_vm0, %v1687_v23 }
  0x73   : > { %1449 = vmatpush.msra.mxu3 %v499_v47  ;;  %v432_v47 = vld [vmem:[%s1920_s15 + $0x108] sm:$0xff]  ;;  %377 = vst.msk [vmem:[#allocation2 + $0x50] sm:$0xff] %vm366_vm0, %v1687_v23 }
  0x74   : > { %653 = vmatmul.f32.gmra.mxu3 %v460_v55  ;;  %931 = vmatpush.msrb.mxu0 %v866_v5  ;;  %378 = vst.msk [vmem:[#allocation2 + $0x58] sm:$0xff] %vm366_vm0, %v1687_v23 }
  0x75   : > { %1450 = vmatpush.msra.mxu3 %v498_v48  ;;  %379 = vst.msk [vmem:[#allocation2 + $0x60] sm:$0xff] %vm366_vm0, %v1687_v23 }
  0x76   : > { %564 = vmatmul.f32.gmra.mxu0 %v427_v40  ;;  %629 = vmatmul.f32.gmra.mxu1 %v428_v41  ;;  %380 = vst.msk [vmem:[#allocation2 + $0x68] sm:$0xff] %vm366_vm0, %v1687_v23  ;;  %v462_v41 = vld [vmem:[%s1920_s15 + $0x1f8] sm:$0xff] }
  0x77   : > { %1451 = vmatpush.msra.mxu3 %v497_v49  ;;  %v437_v49 = vld [vmem:[%s1920_s15 + $0x130] sm:$0xff]  ;;  %932 = vmatpush.msrb.mxu0 %v865_v12  ;;  %381 = vst.msk [vmem:[#allocation2 + $0x70] sm:$0xff] %vm366_vm0, %v1687_v23 }
  0x78   : > { %691 = vmatmul.f32.gmra.mxu2 %v425_v32  ;;  %382 = vst.msk [vmem:[#allocation2 + $0x78] sm:$0xff] %vm366_vm0, %v1687_v23 }
  0x79   : > { %1452 = vmatpush.msra.mxu3 %v496_v50  ;;  %v422_v50 = vld [vmem:[%s1920_s15 + $0xb8] sm:$0xff] }
  0x7b   : > { %1453 = vmatpush.msra.mxu3 %v495_v52  ;;  %v844_v52 = vld [vmem:[#allocation3 + $0x28] sm:$0xff] }
  0x7c   : > { %709 = vmatmul.f32.vlgmr.msra.gmra.mxu3 %v449_v56  ;;  %1042 = vmatpush.msrb.mxu1 %v844_v52  ;;  %v441_v56 = vld [vmem:[%s1920_s15 + $0x150] sm:$0xff] }
  0x7d   : > { %722 = vmatpush.msrb.mxu3 %v526_v58  ;;  %v439_v58 = vld [vmem:[%s1920_s15 + $0x140] sm:$0xff] }
  0x7e   : > { %567 = vmatmul.f32.gmra.mxu0 %v431_v46  ;;  %632 = vmatmul.f32.gmra.mxu1 %v432_v47 }
  0x7f   : > { %723 = vmatpush.msrb.mxu3 %v525_v59  ;;  %v440_v59 = vld [vmem:[%s1920_s15 + $0x148] sm:$0xff] }
  0x80   : > { %694 = vmatmul.f32.gmra.mxu2 %v429_v38 }
  0x81   : > { %724 = vmatpush.msrb.mxu3 %v524_v62  ;;  %v843_v62 = vld [vmem:[#allocation3 + $0x20] sm:$0xff] }
  0x82   : > { %1043 = vmatpush.msrb.mxu1 %v843_v62  ;;  %v384_v62 = vld [vmem:[#allocation2 + $0x8] sm:$0xff] }
  0x83   : > { %725 = vmatpush.msrb.mxu3 %v523_v0  ;;  %v430_v0 = vld [vmem:[%s1920_s15 + $0xf8] sm:$0xff] }
  0x84   : > { %712 = vmatmul.f32.gmra.mxu3 %v453_v1  ;;  %v443_v1 = vld [vmem:[%s1920_s15 + $0x160] sm:$0xff] }
  0x85   : > { %726 = vmatpush.msrb.mxu3 %v522_v2  ;;  %v444_v2 = vld [vmem:[%s1920_s15 + $0x168] sm:$0xff] }
  0x86   : > { %570 = vmatmul.f32.gmra.mxu0 %v435_v53  ;;  %635 = vmatmul.f32.gmra.mxu1 %v436_v54  ;;  %v383_v53 = vld [vmem:[#allocation2] sm:$0xff] }
  0x87   : > { %727 = vmatpush.msrb.mxu3 %v521_v3 }
  0x88   : > { %697 = vmatmul.f32.gmra.mxu2 %v433_v44  ;;  %v824_v44 = vld [vmem:[%s2131_s28 + $0x8] sm:$0xff] }
  0x89   : > { %728 = vmatpush.msrb.mxu3 %v520_v6  ;;  %v842_v6 = vld [vmem:[#allocation3 + $0x18] sm:$0xff] }
  0x8a   : > { %1044 = vmatpush.msrb.mxu1 %v842_v6  ;;  %v827_v6 = vld [vmem:[%s2131_s28 + $0x20] sm:$0xff] }
  0x8b   : > { %729 = vmatpush.msrb.mxu3 %v519_v8 }
  0x8c   : > { %715 = vmatmul.f32.gmra.mxu3 %v457_v9  ;;  %v438_v9 = vld [vmem:[%s1920_s15 + $0x138] sm:$0xff]  ;;  %1045 = vmatpush.msrb.mxu1 %v841_v13 }
  0x8d   : > { %730 = vmatpush.msrb.mxu3 %v518_v10 }
  0x8e   : > { %573 = vmatmul.f32.gmra.mxu0 %v439_v58  ;;  %638 = vmatmul.f32.gmra.mxu1 %v440_v59  ;;  %v826_v59 = vld [vmem:[%s2131_s28 + $0x18] sm:$0xff] }
  0x8f   : > { %731 = vmatpush.msrb.mxu3 %v517_v11 }
  0x90   : > { %700 = vmatmul.f32.gmra.mxu2 %v437_v49  ;;  %v825_v49 = vld [vmem:[%s2131_s28 + $0x10] sm:$0xff] }
  0x91   : > { %732 = vmatpush.msrb.mxu3 %v516_v14  ;;  %v442_v14 = vld [vmem:[%s1920_s15 + $0x158] sm:$0xff] }
  0x93   : > { %733 = vmatpush.msrb.mxu3 %v515_v16 }
  0x94   : > { %718 = vmatmul.f32.gmra.mxu3 %v461_v17  ;;  %v446_v17 = vld [vmem:[%s1920_s15 + $0x178] sm:$0xff] }
  0x95   : > { %734 = vmatpush.msrb.mxu3 %v514_v18  ;;  %v864_v18 = vld [vmem:[#allocation6 + $0x8] sm:$0xff] }
  0x96   : > { %576 = vmatmul.f32.gmra.mxu0 %v443_v1  ;;  %641 = vmatmul.f32.gmra.mxu1 %v444_v2 }
  0x97   : > { %735 = vmatpush.msrb.mxu3 %v513_v19  ;;  %v840_v19 = vld [vmem:[#allocation3 + $0x8] sm:$0xff]  ;;  %933 = vmatpush.msrb.mxu0 %v864_v18 }
  0x98   : > { %703 = vmatmul.f32.gmra.mxu2 %v441_v56  ;;  %1046 = vmatpush.msrb.mxu1 %v840_v19  ;;  %v1127_v19 = vld [vmem:[%s2320_s5 + $0x70] sm:$0xff] }
  0x99   : > { %736 = vmatpush.msrb.mxu3 %v512_v22  ;;  %v450_v22 = vld [vmem:[%s1920_s15 + $0x198] sm:$0xff]  ;;  %934 = vmatpush.msrb.mxu0 %v863_v30  ;;  %v829_v30 = vld [vmem:[%s2131_s28 + $0x30] sm:$0xff] }
  0x9a   : > { %1047 = vmatpush.msrb.mxu1 %v839_v31 }
  0x9b   : > { %737 = vmatpush.msrb.mxu3 %v511_v24 }
  0x9c   : > { %738 = vmatmul.f32.vlgmr.msrb.gmra.mxu3 %v402_v25 }
  0x9e   : > { %1383 = vmatmul.msk.f32.vlgmr.msrb.gmra.mxu1 %vm366_vm0, %v823_v37 }
  0xa0   : > { %706 = vmatmul.f32.gmra.mxu2 %v445_v63 }
  0xa4   : > { %741 = vmatmul.f32.gmra.mxu3 %v406_v29 }
  0xa6   : > { %1384 = vmatmul.msk.f32.gmra.mxu1 %vm366_vm0, %v824_v44 }
  0xac   : > { %744 = vmatmul.f32.gmra.mxu3 %v410_v33 }
  0xae   : > { %1385 = vmatmul.msk.f32.gmra.mxu1 %vm366_vm0, %v825_v49  ;;  %v388_v49 = vld [vmem:[#allocation2 + $0x28] sm:$0xff] }
  0xb4   : > { %747 = vmatmul.f32.gmra.mxu3 %v414_v39 }
  0xb6   : > { %1386 = vmatmul.msk.f32.gmra.mxu1 %vm366_vm0, %v826_v59 }
  0xbb   : > { %v544_v24 = vpop.f32.mrf.mxu0  ;;  %v609_v26 = vpop.f32.mrf.mxu1 }
  0xbc   : > { %750 = vmatmul.f32.gmra.mxu3 %v418_v45 }
  0xbe   : > { %1387 = vmatmul.msk.f32.gmra.mxu1 %vm366_vm0, %v827_v6  ;;  %v1122_v6 = vld [vmem:[%s2320_s5 + $0x48] sm:$0xff] }
  0xbf   : > { %v580_v48 = vpop.f32.mrf.mxu3 }
  0xc3   : > { %v547_v34 = vpop.f32.mrf.mxu0  ;;  %v612_v36 = vpop.f32.mrf.mxu1 }
  0xc4   : > { %753 = vmatmul.f32.gmra.mxu3 %v422_v50  ;;  %v613_v56 = vadd.f32 %v612_v36, %v547_v34  ;;  %v387_v34 = vld [vmem:[#allocation2 + $0x20] sm:$0xff] }
  0xc7   : > { %v583_v55 = vpop.f32.mrf.mxu3 }
  0xcb   : > { %v674_v29 = vpop.f32.mrf.mxu2  ;;  %v550_v42 = vpop.f32.mrf.mxu0 }
  0xcc   : > { %756 = vmatmul.f32.gmra.mxu3 %v426_v57  ;;  %v615_v43 = vpop.f32.mrf.mxu1 }
  0xcd   : > { %v616_v2 = vadd.f32 %v615_v43, %v550_v42  ;;  %v830_v42 = vld [vmem:[%s2131_s28 + $0x38] sm:$0xff] }
  0xcf   : > { %v586_v60 = vpop.f32.mrf.mxu3 }
  0xd3   : > { %v677_v38 = vpop.f32.mrf.mxu2  ;;  %v553_v51 = vpop.f32.mrf.mxu0 }
  0xd4   : > { %759 = vmatmul.f32.gmra.mxu3 %v430_v0  ;;  %v618_v52 = vpop.f32.mrf.mxu1 }
  0xd5   : > { %v619_v12 = vadd.f32 %v618_v52, %v553_v51 }
  0xd7   : > { %v589_v3 = vpop.f32.mrf.mxu3 }
  0xdb   : > { %v680_v46 = vpop.f32.mrf.mxu2  ;;  %v556_v61 = vpop.f32.mrf.mxu0 }
  0xdc   : > { %762 = vmatmul.f32.gmra.mxu3 %v434_v4  ;;  %v621_v0 = vpop.f32.mrf.mxu1 }
  0xdf   : > { %v645_v7 = vpop.f32.mrf.mxu3 }
  0xe0   : > { %v646_v8 = vadd.f32 %v645_v7, %v580_v48  ;;  %v610_v48 = vadd.f32 %v609_v26, %v544_v24  ;;  %v681_v7 = vadd.f32 %v680_v46, %v616_v2  ;;  %v622_v24 = vadd.f32 %v621_v0, %v556_v61  ;;  %v1124_v46 = vld [vmem:[%s2320_s5 + $0x58] sm:$0xff] }
  0xe2   : > { %v675_v50 = vadd.f32 %v674_v29, %v610_v48 }
  0xe3   : > { %v683_v57 = vpop.f32.mrf.mxu2  ;;  %v559_v13 = vpop.f32.mrf.mxu0 }
  0xe4   : > { %765 = vmatmul.f32.gmra.mxu3 %v438_v9  ;;  %v385_v9 = vld [vmem:[#allocation2 + $0x10] sm:$0xff]  ;;  %v684_v18 = vadd.f32 %v683_v57, %v619_v12 }
  0xe7   : > { %v648_v10 = vpop.f32.mrf.mxu3 }
  0xe8   : > { %v649_v11 = vadd.f32 %v648_v10, %v583_v55 }
  0xeb   : > { %v686_v5 = vpop.f32.mrf.mxu2  ;;  %v562_v26 = vpop.f32.mrf.mxu0 }
  0xec   : > { %768 = vmatmul.f32.gmra.mxu3 %v442_v14  ;;  %v624_v14 = vpop.f32.mrf.mxu1  ;;  %v687_v31 = vadd.f32 %v686_v5, %v622_v24 }
  0xef   : > { %v651_v15 = vpop.f32.mrf.mxu3 }
  0xf0   : > { %v652_v16 = vadd.f32 %v651_v15, %v586_v60  ;;  %v678_v60 = vadd.f32 %v677_v38, %v613_v56  ;;  %v625_v38 = vadd.f32 %v624_v14, %v559_v13  ;;  %v831_v56 = vld [vmem:[%s2131_s28 + $0x40] sm:$0xff] }
  0xf3   : > { %v565_v44 = vpop.f32.mrf.mxu0 }
  0xf4   : > { %771 = vmatmul.f32.gmra.mxu3 %v446_v17  ;;  %v828_v17 = vld [vmem:[%s2131_s28 + $0x28] sm:$0xff]  ;;  %v627_v29 = vpop.f32.mrf.mxu1 }
  0xf5   : > { %1388 = vmatmul.msk.f32.gmra.mxu1 %vm366_vm0, %v828_v17  ;;  %v628_v52 = vadd.f32 %v627_v29, %v562_v26  ;;  %v1121_v17 = vld [vmem:[%s2320_s5 + $0x40] sm:$0xff]  ;;  %v834_v29 = vld [vmem:[%s2131_s28 + $0x58] sm:$0xff] }
  0xf7   : > { %v654_v20 = vpop.f32.mrf.mxu3 }
  0xf8   : > { %v655_v21 = vadd.f32 %v654_v20, %v589_v3  ;;  %v689_v20 = vpop.f32.mrf.mxu2 }
  0xf9   : > { %v690_v43 = vadd.f32 %v689_v20, %v625_v38  ;;  %v391_v20 = vld [vmem:[#allocation2 + $0x40] sm:$0xff] }
  0xfb   : > { %v568_v59 = vpop.f32.mrf.mxu0 }
  0xfc   : > { %774 = vmatmul.f32.gmra.mxu3 %v450_v22  ;;  %v630_v48 = vpop.f32.mrf.mxu1 }
  0xfd   : > { %1389 = vmatmul.msk.f32.gmra.mxu1 %vm366_vm0, %v829_v30  ;;  %v631_v0 = vadd.f32 %v630_v48, %v565_v44 }
  0xff   : > { %v710_v25 = vpop.f32.mrf.mxu3 }
 0x100   : > { %v2113_v27 = vadd.f32 %v710_v25, %v646_v8  ;;  %v1128_v8 = vld [vmem:[%s2320_s5 + $0x78] sm:$0xff]  ;;  %v692_v36 = vpop.f32.mrf.mxu2 }
 0x101   : > { %1129 = vmatpush.msrb.mxu2 %v1128_v8  ;;  %v693_v57 = vadd.f32 %v692_v36, %v628_v52 }
 0x103   : > { %1130 = vmatpush.msrb.mxu2 %v1127_v19 }
 0x104   : > { %777 = vmatmul.f32.gmra.mxu3 %v454_v28 }
 0x105   : > { %1390 = vmatmul.msk.f32.gmra.mxu1 %vm366_vm0, %v830_v42 }
 0x107   : > { %v713_v32 = vpop.f32.mrf.mxu3 }
 0x108   : > { %v2125_v33 = vadd.f32 %v713_v32, %v649_v11  ;;  %v1126_v32 = vld [vmem:[%s2320_s5 + $0x68] sm:$0xff] }
 0x109   : > { %1131 = vmatpush.msrb.mxu2 %v1126_v32  ;;  %v392_v32 = vld [vmem:[#allocation2 + $0x48] sm:$0xff] }
 0x10c   : > { %780 = vmatmul.f32.gmra.mxu3 %v458_v35 }
 0x10d   : > { %1391 = vmatmul.msk.f32.gmra.mxu1 %vm366_vm0, %v831_v56  ;;  %v1117_v56 = vld [vmem:[%s2320_s5 + $0x20] sm:$0xff] }
 0x10f   : > { %v716_v39 = vpop.f32.mrf.mxu3 }
 0x110   : > { %v2136_v40 = vadd.f32 %v716_v39, %v652_v16 }
 0x114   : > { %783 = vmatmul.f32.gmra.mxu3 %v462_v41 }
 0x117   : > { %v719_v45 = vpop.f32.mrf.mxu3 }
 0x118   : > { %v2141_v47 = vadd.f32 %v719_v45, %v655_v21  ;;  %v386_v21 = vld [vmem:[#allocation2 + $0x18] sm:$0xff]  ;;  %v1125_v45 = vld [vmem:[%s2320_s5 + $0x60] sm:$0xff] }
 0x119   : > { %1132 = vmatpush.msrb.mxu2 %v1125_v45 }
 0x11b   : > { %1133 = vmatpush.msrb.mxu2 %v1124_v46  ;;  %v393_v46 = vld [vmem:[#allocation2 + $0x50] sm:$0xff] }
 0x11f   : > { %v739_v54 = vpop.f32.mrf.mxu3 }
 0x120   : > { %v740_v55 = vadd.f32 %v739_v54, %v675_v50 }
 0x122   : > { %v787_v58 = vadd.f32 %v740_v55, %v383_v53  ;;  %v695_v53 = vpop.f32.mrf.mxu2 }
 0x123   : > { %v696_v5 = vadd.f32 %v695_v53, %v631_v0  ;;  %v1115_v0 = vld [vmem:[%s2320_s5 + $0x10] sm:$0xff] }
 0x124   : > { %804 = vst.msk [vmem:[#allocation2] sm:$0xff] %vm366_vm0, %v787_v58  ;;  %v1123_v58 = vld [vmem:[%s2320_s5 + $0x50] sm:$0xff] }
 0x125   : > { %1134 = vmatpush.msrb.mxu2 %v1123_v58  ;;  %v394_v58 = vld [vmem:[#allocation2 + $0x58] sm:$0xff] }
 0x127   : > { %v742_v63 = vpop.f32.mrf.mxu3  ;;  %1135 = vmatpush.msrb.mxu2 %v1122_v6 }
 0x128   : > { %v743_v1 = vadd.f32 %v742_v63, %v678_v60  ;;  %v389_v60 = vld [vmem:[#allocation2 + $0x30] sm:$0xff] }
 0x129   : > { %1136 = vmatpush.msrb.mxu2 %v1121_v17 }
 0x12a   : > { %v788_v3 = vadd.f32 %v743_v1, %v384_v62  ;;  %v633_v62 = vpop.f32.mrf.mxu1 }
 0x12b   : > { %v847_v4 = vld [vmem:[#allocation2] sm:$0xff] }
 0x12c   : > { %805 = vst.msk [vmem:[#allocation2 + $0x8] sm:$0xff] %vm366_vm0, %v788_v3  ;;  %1367 = vmatmul.msk.f32.vlgmr.msrb.gmra.mxu0 %vm366_vm0, %v847_v4  ;;  %v698_v3 = vpop.f32.mrf.mxu2  ;;  %v832_v4 = vld [vmem:[%s2131_s28 + $0x48] sm:$0xff] }
 0x12d   : > { %1392 = vmatmul.msk.f32.gmra.mxu1 %vm366_vm0, %v832_v4 }
 0x12f   : > { %v745_v10 = vpop.f32.mrf.mxu3 }
 0x130   : > { %v746_v11 = vadd.f32 %v745_v10, %v681_v7  ;;  %v390_v7 = vld [vmem:[#allocation2 + $0x38] sm:$0xff]  ;;  %v634_v10 = vadd.f32 %v633_v62, %v568_v59 }
 0x132   : > { %v789_v15 = vadd.f32 %v746_v11, %v385_v9  ;;  %v571_v11 = vpop.f32.mrf.mxu0  ;;  %v636_v12 = vpop.f32.mrf.mxu1 }
 0x133   : > { %v848_v16 = vld [vmem:[#allocation2 + $0x8] sm:$0xff] }
 0x134   : > { %806 = vst.msk [vmem:[#allocation2 + $0x10] sm:$0xff] %vm366_vm0, %v789_v15  ;;  %1368 = vmatmul.msk.f32.gmra.mxu0 %vm366_vm0, %v848_v16  ;;  %v833_v15 = vld [vmem:[%s2131_s28 + $0x50] sm:$0xff]  ;;  %v699_v16 = vadd.f32 %v698_v3, %v634_v10  ;;  %v701_v19 = vpop.f32.mrf.mxu2 }
 0x135   : > { %1393 = vmatmul.msk.f32.gmra.mxu1 %vm366_vm0, %v833_v15 }
 0x137   : > { %v748_v22 = vpop.f32.mrf.mxu3 }
 0x138   : > { %v749_v23 = vadd.f32 %v748_v22, %v684_v18  ;;  %v1120_v18 = vld [vmem:[%s2320_s5 + $0x38] sm:$0xff] }
 0x139   : > { %1137 = vmatpush.msrb.mxu2 %v1120_v18 }
 0x13a   : > { %v790_v25 = vadd.f32 %v749_v23, %v386_v21  ;;  %v637_v23 = vadd.f32 %v636_v12, %v571_v11  ;;  %v574_v26 = vpop.f32.mrf.mxu0 }
 0x13b   : > { %v849_v28 = vld [vmem:[#allocation2 + $0x10] sm:$0xff] }
 0x13c   : > { %807 = vst.msk [vmem:[#allocation2 + $0x18] sm:$0xff] %vm366_vm0, %v790_v25  ;;  %1369 = vmatmul.msk.f32.gmra.mxu0 %vm366_vm0, %v849_v28  ;;  %v639_v28 = vpop.f32.mrf.mxu1  ;;  %v702_v30 = vadd.f32 %v701_v19, %v637_v23 }
 0x13d   : > { %1394 = vmatmul.msk.f32.gmra.mxu1 %vm366_vm0, %v834_v29 }
 0x13f   : > { %v751_v35 = vpop.f32.mrf.mxu3 }
 0x140   : > { %v752_v37 = vadd.f32 %v751_v35, %v687_v31  ;;  %v1119_v31 = vld [vmem:[%s2320_s5 + $0x30] sm:$0xff]  ;;  %v704_v35 = vpop.f32.mrf.mxu2 }
 0x141   : > { %1138 = vmatpush.msrb.mxu2 %v1119_v31 }
 0x142   : > { %v791_v39 = vadd.f32 %v752_v37, %v387_v34  ;;  %v640_v37 = vadd.f32 %v639_v28, %v574_v26  ;;  %v577_v44 = vpop.f32.mrf.mxu0 }
 0x143   : > { %v850_v41 = vld [vmem:[#allocation2 + $0x18] sm:$0xff] }
 0x144   : > { %808 = vst.msk [vmem:[#allocation2 + $0x20] sm:$0xff] %vm366_vm0, %v791_v39  ;;  %1370 = vmatmul.msk.f32.gmra.mxu0 %vm366_vm0, %v850_v41  ;;  %v835_v41 = vld [vmem:[%s2131_s28 + $0x60] sm:$0xff]  ;;  %v705_v42 = vadd.f32 %v704_v35, %v640_v37  ;;  %v642_v45 = vpop.f32.mrf.mxu1 }
 0x145   : > { %1395 = vmatmul.msk.f32.gmra.mxu1 %vm366_vm0, %v835_v41 }
 0x147   : > { %v754_v50 = vpop.f32.mrf.mxu3 }
 0x148   : > { %v755_v51 = vadd.f32 %v754_v50, %v690_v43  ;;  %v1118_v43 = vld [vmem:[%s2320_s5 + $0x28] sm:$0xff]  ;;  %v643_v50 = vadd.f32 %v642_v45, %v577_v44 }
 0x149   : > { %1139 = vmatpush.msrb.mxu2 %v1118_v43 }
 0x14a   : > { %v792_v54 = vadd.f32 %v755_v51, %v388_v49  ;;  %v707_v51 = vpop.f32.mrf.mxu2 }
 0x14b   : > { %v851_v55 = vld [vmem:[#allocation2 + $0x20] sm:$0xff]  ;;  %1140 = vmatpush.msrb.mxu2 %v1117_v56 }
 0x14c   : > { %809 = vst.msk [vmem:[#allocation2 + $0x28] sm:$0xff] %vm366_vm0, %v792_v54  ;;  %1371 = vmatmul.msk.f32.gmra.mxu0 %vm366_vm0, %v851_v55  ;;  %v836_v54 = vld [vmem:[%s2131_s28 + $0x68] sm:$0xff]  ;;  %v708_v55 = vadd.f32 %v707_v51, %v643_v50  ;;  %v1049_v12 = vpop.f32.mrf.mxu1 }
 0x14d   : > { %1396 = vmatmul.msk.f32.gmra.mxu1 %vm366_vm0, %v836_v54 }
 0x14f   : > { %v757_v61 = vpop.f32.mrf.mxu3 }
 0x150   : > { %v758_v63 = vadd.f32 %v757_v61, %v693_v57  ;;  %v1116_v57 = vld [vmem:[%s2320_s5 + $0x18] sm:$0xff] }
 0x151   : > { %1141 = vmatpush.msrb.mxu2 %v1116_v57 }
 0x152   : > { %v793_v1 = vadd.f32 %v758_v63, %v389_v60  ;;  %v837_v63 = vld [vmem:[%s2131_s28 + $0x70] sm:$0xff] }
 0x153   : > { %v852_v2 = vld [vmem:[#allocation2 + $0x28] sm:$0xff]  ;;  %1142 = vmatpush.msrb.mxu2 %v1115_v0 }
 0x154   : > { %810 = vst.msk [vmem:[#allocation2 + $0x30] sm:$0xff] %vm366_vm0, %v793_v1  ;;  %1372 = vmatmul.msk.f32.gmra.mxu0 %vm366_vm0, %v852_v2  ;;  %v1114_v1 = vld [vmem:[%s2320_s5 + $0x8] sm:$0xff]  ;;  %v395_v2 = vld [vmem:[#allocation2 + $0x60] sm:$0xff]  ;;  %v1052_v19 = vpop.f32.mrf.mxu1 }
 0x155   : > { %1397 = vmatmul.msk.f32.gmra.mxu1 %vm366_vm0, %v837_v63  ;;  %1143 = vmatpush.msrb.mxu2 %v1114_v1 }
 0x157   : > { %v760_v8 = vpop.f32.mrf.mxu3 }
 0x158   : > { %v761_v9 = vadd.f32 %v760_v8, %v696_v5  ;;  %v1113_v8 = vld [vmem:[%s2320_s5] sm:$0xff] }
 0x159   : > { %1144 = vmatpush.msrb.mxu2 %v1113_v8 }
 0x15a   : > { %v794_v13 = vadd.f32 %v761_v9, %v390_v7  ;;  %v838_v7 = vld [vmem:[%s2131_s28 + $0x78] sm:$0xff]  ;;  %v396_v9 = vld [vmem:[#allocation2 + $0x68] sm:$0xff]  ;;  %s334_s28 = sand.u32 1, %s1665_s22  }
 0x15b   : > { %v853_v14 = vld [vmem:[#allocation2 + $0x30] sm:$0xff]  ;;  %s1361_s16 = sshll.u32 %s334_s28, 7  ;;  %s1211_s15 = scalar_lea.sflag [#allocation5], %s334_s28 }
 0x15c   : > { %811 = vst.msk [vmem:[#allocation2 + $0x38] sm:$0xff] %vm366_vm0, %v794_v13  ;;  %1373 = vmatmul.msk.f32.gmra.mxu0 %vm366_vm0, %v853_v14  ;;  %v397_v14 = vld [vmem:[#allocation2 + $0x70] sm:$0xff]  ;;  %s2258_s17 = scalar_lea.vmem [#allocation8], %s1361_s16 }
 0x15d   : > { %1398 = vmatmul.msk.f32.gmra.mxu1 %vm366_vm0, %v838_v7  ;;  %s1223_s11 = sshll.u32 %s2258_s17, 4  ;;  %s1224_s11 = int_to_ptr.vmem [resolvable:$true] %s1223_s11 }
 0x15f   : > { %v763_v21 = vpop.f32.mrf.mxu3 }
 0x160   : > { %v764_v22 = vadd.f32 %v763_v21, %v699_v16 }
 0x162   : > { %v795_v24 = vadd.f32 %v764_v22, %v391_v20  ;;  %v398_v20 = vld [vmem:[#allocation2 + $0x78] sm:$0xff] }
 0x163   : > { %v854_v25 = vld [vmem:[#allocation2 + $0x38] sm:$0xff] }
 0x164   : > { %812 = vst.msk [vmem:[#allocation2 + $0x40] sm:$0xff] %vm366_vm0, %v795_v24  ;;  %1374 = vmatmul.msk.f32.gmra.mxu0 %vm366_vm0, %v854_v25  ;;  %v1055_v24 = vpop.f32.mrf.mxu1 }
 0x167   : > { %v766_v34 = vpop.f32.mrf.mxu3 }
 0x168   : > { %v767_v36 = vadd.f32 %v766_v34, %v702_v30 }
 0x16a   : > { %v796_v38 = vadd.f32 %v767_v36, %v392_v32 }
 0x16b   : > { %v855_v39 = vld [vmem:[#allocation2 + $0x40] sm:$0xff] }
 0x16c   : > { %813 = vst.msk [vmem:[#allocation2 + $0x48] sm:$0xff] %vm366_vm0, %v796_v38  ;;  %1375 = vmatmul.msk.f32.gmra.mxu0 %vm366_vm0, %v855_v39 }
 0x16f   : > { %v769_v48 = vpop.f32.mrf.mxu3 }
 0x170   : > { %v770_v49 = vadd.f32 %v769_v48, %v705_v42 }
 0x172   : > { %v797_v52 = vadd.f32 %v770_v49, %v393_v46 }
 0x173   : > { %v856_v53 = vld [vmem:[#allocation2 + $0x48] sm:$0xff] }
 0x174   : > { %814 = vst.msk [vmem:[#allocation2 + $0x50] sm:$0xff] %vm366_vm0, %v797_v52  ;;  %1376 = vmatmul.msk.f32.gmra.mxu0 %vm366_vm0, %v856_v53 }
 0x177   : > { %v772_v59 = vpop.f32.mrf.mxu3 }
 0x178   : > { %v773_v60 = vadd.f32 %v772_v59, %v708_v55 }
 0x17a   : > { %v798_v61 = vadd.f32 %v773_v60, %v394_v58 }
 0x17b   : > { %v857_v62 = vld [vmem:[#allocation2 + $0x50] sm:$0xff] }
 0x17c   : > { %815 = vst.msk [vmem:[#allocation2 + $0x58] sm:$0xff] %vm366_vm0, %v798_v61  ;;  %1377 = vmatmul.msk.f32.gmra.mxu0 %vm366_vm0, %v857_v62 }
 0x17f   : > { %v775_v3 = vpop.f32.mrf.mxu3 }
 0x180   : > { %v776_v4 = vadd.f32 %v775_v3, %v2113_v27 }
 0x182   : > { %v799_v5 = vadd.f32 %v776_v4, %v395_v2 }
 0x183   : > { %v858_v6 = vld [vmem:[#allocation2 + $0x58] sm:$0xff] }
 0x184   : > { %816 = vst.msk [vmem:[#allocation2 + $0x60] sm:$0xff] %vm366_vm0, %v799_v5  ;;  %1378 = vmatmul.msk.f32.gmra.mxu0 %vm366_vm0, %v858_v6 }
 0x187   : > { %v778_v10 = vpop.f32.mrf.mxu3 }
 0x188   : > { %v779_v11 = vadd.f32 %v778_v10, %v2125_v33 }
 0x18a   : > { %v800_v27 = vadd.f32 %v779_v11, %v396_v9 }
 0x18b   : > { %v859_v13 = vld [vmem:[#allocation2 + $0x60] sm:$0xff] }
 0x18c   : > { %817 = vst.msk [vmem:[#allocation2 + $0x68] sm:$0xff] %vm366_vm0, %v800_v27  ;;  %1379 = vmatmul.msk.f32.gmra.mxu0 %vm366_vm0, %v859_v13 }
 0x18f   : > { %v781_v15 = vpop.f32.mrf.mxu3 }
 0x190   : > { %v782_v16 = vadd.f32 %v781_v15, %v2136_v40  ;;  %v1058_v40 = vpop.f32.mrf.mxu1 }
 0x192   : > { %v801_v17 = vadd.f32 %v782_v16, %v397_v14 }
 0x193   : > { %v860_v18 = vld [vmem:[#allocation2 + $0x68] sm:$0xff] }
 0x194   : > { %818 = vst.msk [vmem:[#allocation2 + $0x70] sm:$0xff] %vm366_vm0, %v801_v17  ;;  %1380 = vmatmul.msk.f32.gmra.mxu0 %vm366_vm0, %v860_v18 }
 0x197   : > { %v784_v33 = vpop.f32.mrf.mxu3 }
 0x198   : > { %v785_v21 = vadd.f32 %v784_v33, %v2141_v47  ;;  %v1061_v31 = vpop.f32.mrf.mxu1 }
 0x19a   : > { %v802_v22 = vadd.f32 %v785_v21, %v398_v20 }
 0x19b   : > { %v861_v23 = vld [vmem:[#allocation2 + $0x70] sm:$0xff] }
 0x19c   : > { %819 = vst.msk [vmem:[#allocation2 + $0x78] sm:$0xff] %vm366_vm0, %v802_v22  ;;  %1381 = vmatmul.msk.f32.gmra.mxu0 %vm366_vm0, %v861_v23 }
 0x1a0   : > { %v1064_v36 = vpop.f32.mrf.mxu1 }
 0x1a3   : > { %v862_v25 = vld [vmem:[#allocation2 + $0x78] sm:$0xff] }
 0x1a4   : > { %1382 = vmatmul.msk.f32.gmra.mxu0 %vm366_vm0, %v862_v25 }
 0x1a8   : > { %v1067_v42 = vpop.f32.mrf.mxu1 }
 0x1a9   : > { %v936_v26 = vpop.f32.mrf.mxu0 }
 0x1aa   : > { %v1050_v28 = vadd.f32 %v1049_v12, %v936_v26 }
 0x1ac   : > { %v1097_v29 = vmax.f32 %v1050_v28, 0.0 }
 0x1ae   : > { %1145 = vmatmul.f32.vlgmr.msrb.gmra.mxu2 %v1097_v29 }
 0x1b0   : > { %v1070_v46 = vpop.f32.mrf.mxu1 }
 0x1b1   : > { %v939_v30 = vpop.f32.mrf.mxu0 }
 0x1b2   : > { %v1053_v32 = vadd.f32 %v1052_v19, %v939_v30 }
 0x1b4   : > { %v1098_v34 = vmax.f32 %v1053_v32, 0.0 }
 0x1b6   : > { %1148 = vmatmul.f32.gmra.mxu2 %v1098_v34 }
 0x1b8   : > { %v1073_v52 = vpop.f32.mrf.mxu1 }
 0x1b9   : > { %v942_v47 = vpop.f32.mrf.mxu0 }
 0x1ba   : > { %v1056_v35 = vadd.f32 %v1055_v24, %v942_v47 }
 0x1bc   : > { %v1099_v37 = vmax.f32 %v1056_v35, 0.0 }
 0x1be   : > { %1151 = vmatmul.f32.gmra.mxu2 %v1099_v37 }
 0x1c0   : > { %v1076_v57 = vpop.f32.mrf.mxu1 }
 0x1c1   : > { %v945_v38 = vpop.f32.mrf.mxu0 }
 0x1c2   : > { %v1059_v39 = vadd.f32 %v1058_v40, %v945_v38 }
 0x1c4   : > { %v1100_v41 = vmax.f32 %v1059_v39, 0.0 }
 0x1c6   : > { %1154 = vmatmul.f32.gmra.mxu2 %v1100_v41 }
 0x1c8   : > { %v1079_v62 = vpop.f32.mrf.mxu1 }
 0x1c9   : > { %v948_v43 = vpop.f32.mrf.mxu0 }
 0x1ca   : > { %v1062_v44 = vadd.f32 %v1061_v31, %v948_v43 }
 0x1cc   : > { %v1101_v45 = vmax.f32 %v1062_v44, 0.0 }
 0x1ce   : > { %1157 = vmatmul.f32.gmra.mxu2 %v1101_v45 }
 0x1d0   : > { %v1082_v2 = vpop.f32.mrf.mxu1 }
 0x1d1   : > { %v951_v48 = vpop.f32.mrf.mxu0 }
 0x1d2   : > { %v1065_v49 = vadd.f32 %v1064_v36, %v951_v48 }
 0x1d4   : > { %v1102_v50 = vmax.f32 %v1065_v49, 0.0 }
 0x1d6   : > { %1160 = vmatmul.f32.gmra.mxu2 %v1102_v50 }
 0x1d8   : > { %v1085_v7 = vpop.f32.mrf.mxu1 }
 0x1d9   : > { %v954_v51 = vpop.f32.mrf.mxu0 }
 0x1da   : > { %v1068_v53 = vadd.f32 %v1067_v42, %v954_v51 }
 0x1dc   : > { %v1103_v54 = vmax.f32 %v1068_v53, 0.0 }
 0x1de   : > { %1163 = vmatmul.f32.gmra.mxu2 %v1103_v54 }
 0x1e0   : > { %v1088_v12 = vpop.f32.mrf.mxu1 }
 0x1e1   : > { %v957_v55 = vpop.f32.mrf.mxu0 }
 0x1e2   : > { %v1071_v56 = vadd.f32 %v1070_v46, %v957_v55 }
 0x1e4   : > { %v1104_v58 = vmax.f32 %v1071_v56, 0.0 }
 0x1e6   : > { %1166 = vmatmul.f32.gmra.mxu2 %v1104_v58 }
 0x1e8   : > { %v1091_v16 = vpop.f32.mrf.mxu1 }
 0x1e9   : > { %v960_v59 = vpop.f32.mrf.mxu0 }
 0x1ea   : > { %v1074_v60 = vadd.f32 %v1073_v52, %v960_v59 }
 0x1ec   : > { %v1105_v61 = vmax.f32 %v1074_v60, 0.0 }
 0x1ee   : > { %1169 = vmatmul.f32.gmra.mxu2 %v1105_v61 }
 0x1f0   : > { %v1094_v20 = vpop.f32.mrf.mxu1 }
 0x1f1   : > { %v963_v63 = vpop.f32.mrf.mxu0 }
 0x1f2   : > { %v1077_v0 = vadd.f32 %v1076_v57, %v963_v63 }
 0x1f4   : > { %v1106_v1 = vmax.f32 %v1077_v0, 0.0 }
 0x1f6   : > { %1172 = vmatmul.f32.gmra.mxu2 %v1106_v1 }
 0x1f9   : > { %v966_v3 = vpop.f32.mrf.mxu0 }
 0x1fa   : > { %v1080_v4 = vadd.f32 %v1079_v62, %v966_v3 }
 0x1fc   : > { %v1107_v5 = vmax.f32 %v1080_v4, 0.0 }
 0x1fe   : > { %1175 = vmatmul.f32.gmra.mxu2 %v1107_v5 }
 0x201   : > { %v969_v6 = vpop.f32.mrf.mxu0 }
 0x202   : > { %v1083_v8 = vadd.f32 %v1082_v2, %v969_v6 }
 0x204   : > { %v1108_v9 = vmax.f32 %v1083_v8, 0.0 }
 0x206   : > { %1178 = vmatmul.f32.gmra.mxu2 %v1108_v9 }
 0x209   : > { %v972_v10 = vpop.f32.mrf.mxu0 }
 0x20a   : > { %v1086_v11 = vadd.f32 %v1085_v7, %v972_v10 }
 0x20c   : > { %v1109_v27 = vmax.f32 %v1086_v11, 0.0 }
 0x20e   : > { %1181 = vmatmul.f32.gmra.mxu2 %v1109_v27 }
 0x211   : > { %v975_v13 = vpop.f32.mrf.mxu0 }
 0x212   : > { %v1089_v14 = vadd.f32 %v1088_v12, %v975_v13 }
 0x214   : > { %v1110_v15 = vmax.f32 %v1089_v14, 0.0 }
 0x216   : > { %1184 = vmatmul.f32.gmra.mxu2 %v1110_v15 }
 0x219   : > { %v978_v17 = vpop.f32.mrf.mxu0 }
 0x21a   : > { %v1092_v18 = vadd.f32 %v1091_v16, %v978_v17 }
 0x21c   : > { %v1111_v19 = vmax.f32 %v1092_v18, 0.0 }
 0x21e   : > { %1187 = vmatmul.f32.gmra.mxu2 %v1111_v19 }
 0x221   : > { %v981_v33 = vpop.f32.mrf.mxu0 }
 0x222   : > { %v1095_v21 = vadd.f32 %v1094_v20, %v981_v33 }
 0x224   : > { %v1112_v22 = vmax.f32 %v1095_v21, 0.0 }
 0x226   : > { %1190 = vmatmul.f32.gmra.mxu2 %v1112_v22 }
 0x231   : > { %v1146_v23 = vpop.f32.mrf.mxu2 }
 0x232   : > { %1194 = vst [vmem:[%s2258_s17] sm:$0xff] %v1146_v23 }
 0x239   : > { %v1149_v24 = vpop.f32.mrf.mxu2 }
 0x23a   : > { %1195 = vst [vmem:[%s2258_s17 + $0x8] sm:$0xff] %v1149_v24 }
 0x241   : > { %v1152_v25 = vpop.f32.mrf.mxu2 }
 0x242   : > { %1196 = vst [vmem:[%s2258_s17 + $0x10] sm:$0xff] %v1152_v25 }
 0x249   : > { %v1155_v40 = vpop.f32.mrf.mxu2 }
 0x24a   : > { %1197 = vst [vmem:[%s2258_s17 + $0x18] sm:$0xff] %v1155_v40 }
 0x251   : > { %v1158_v26 = vpop.f32.mrf.mxu2 }
 0x252   : > { %1198 = vst [vmem:[%s2258_s17 + $0x20] sm:$0xff] %v1158_v26 }
 0x259   : > { %v1161_v28 = vpop.f32.mrf.mxu2 }
 0x25a   : > { %1199 = vst [vmem:[%s2258_s17 + $0x28] sm:$0xff] %v1161_v28 }
 0x261   : > { %v1164_v29 = vpop.f32.mrf.mxu2 }
 0x262   : > { %1200 = vst [vmem:[%s2258_s17 + $0x30] sm:$0xff] %v1164_v29 }
 0x269   : > { %v1167_v30 = vpop.f32.mrf.mxu2 }
 0x26a   : > { %1201 = vst [vmem:[%s2258_s17 + $0x38] sm:$0xff] %v1167_v30 }
 0x271   : > { %v1170_v31 = vpop.f32.mrf.mxu2 }
 0x272   : > { %1202 = vst [vmem:[%s2258_s17 + $0x40] sm:$0xff] %v1170_v31 }
 0x279   : > { %v1173_v32 = vpop.f32.mrf.mxu2 }
 0x27a   : > { %1203 = vst [vmem:[%s2258_s17 + $0x48] sm:$0xff] %v1173_v32 }
 0x281   : > { %v1176_v34 = vpop.f32.mrf.mxu2 }
 0x282   : > { %1204 = vst [vmem:[%s2258_s17 + $0x50] sm:$0xff] %v1176_v34 }
 0x289   : > { %v1179_v47 = vpop.f32.mrf.mxu2 }
 0x28a   : > { %1205 = vst [vmem:[%s2258_s17 + $0x58] sm:$0xff] %v1179_v47 }
 0x291   : > { %v1182_v35 = vpop.f32.mrf.mxu2 }
 0x292   : > { %1206 = vst [vmem:[%s2258_s17 + $0x60] sm:$0xff] %v1182_v35 }
 0x299   : > { %v1185_v36 = vpop.f32.mrf.mxu2 }
 0x29a   : > { %1207 = vst [vmem:[%s2258_s17 + $0x68] sm:$0xff] %v1185_v36 }
 0x2a1   : > { %v1188_v37 = vpop.f32.mrf.mxu2 }
 0x2a2   : > { %1208 = vst [vmem:[%s2258_s17 + $0x70] sm:$0xff] %v1188_v37 }
 0x2a9   : > { %v1191_v38 = vpop.f32.mrf.mxu2 }
 0x2aa   : > { %1209 = vst [vmem:[%s2258_s17 + $0x78] sm:$0xff] %v1191_v38 }
 0x2ab   : > { %1622 = shalt.err (!%p1619_p9)
}
 0x2ac   : > { %s1688_s28 = smov 128   ;;  %s1689_s17 = smov 8  }
 0x2ad   : > { %1462 = dma.vmem_to_hbm [thread:$0]  (%p1765_p4), %s1224_s11, 2048, %s1226_s27, %s1211_s15, %s1688_s28, %s1688_s28, %s1689_s17  }
 0x2ae PF: > { %p1479_p10 = scmp.ge.s32.totalorder %s1681_s26, 2  ;;  %s1240_s19 = sand.u32 1, %s1661_s21  }
 0x2af   : > { %s1241_s12 = scalar_lea.sflag [#allocation5], %s1240_s19 }
 0x2b0   : > { %p1472_p11 = pnand %p1479_p10, %p1772_p8 }
 0x2b2   : > { %p1473_p12 = pneg %p1472_p11 }
 0x2b4   : > { %1656 = dma.done.wait (%p1473_p12), %s1241_s12, 2048  }
 0x2b5   : > { %1658 = vsyncadd (%p1473_p12), %s1241_s12, 4294965248  ;;  %s21_s26 = sadd.s32 1, %s1681_s26   ;;  %s2326_s21 = smov %s1665_s22 }
 0x2b6   : > { %p18_p13 = scmp.ge.s32.totalorder %s21_s26, 4   ;;  %s2327_s22 = smov %s1669_s23 }
 0x2b7   : > { %s2328_s23 = smov %s1778_s10  ;;  %s2329_s24 = smov %s1677_s25 }
 0x2b8   : > { %s2330_s25 = smov %s2332_s29  ;;  %20 = sbr.rel (!%p18_p13) target bundleno = 6 (0x6), region = 102 }
 0x2bd   :  { %1247 = vsyncpa [#allocation4], 1 }
 0x2be   :  { %1249 = vsyncpa [#allocation4 + $0x1], 1 }
 0x2bf   :  { %1250 = vsyncpa [#allocation7], 1 }
 0x2c0   :  { %1251 = vsyncpa [#allocation5], 1 }
 0x2c1   :  { %1253 = vsyncpa [#allocation5 + $0x1], 1 }

</bundles_post_ra>
